<compile_context>
chip_gen: v6e
topology: v6e:2x2x1
jax: 0.10.0
libtpu: 0.0.40
codegen_flags: <defaults>
</compile_context>

<pallas_src>
import jax
import jax.numpy as jnp
from jax.experimental import pallas as pl
from jax.experimental.pallas import tpu as pltpu


# Max spatial (lane-axis) tile width. With Cin=1024, Cout=256 fp32 this keeps
# double-buffered x/out tiles + resident weight around ~12 MiB, comfortably
# under v7x's 32 MiB scoped / 64 MiB physical VMEM (and trivially under
# v5e/v6e's 128 MiB).
_TILE_P_MAX = 1024


def _adjust_kernel(x_ref, w_ref, b_ref, o_ref):
    # x_ref: (Cin, tile_p)   activation tile, pixels on the lane axis
    # w_ref: (Cout, Cin)     conv weight with BN scale pre-folded
    # b_ref: (Cout, 1)       folded BN bias
    # o_ref: (Cout, tile_p)
    y = jnp.dot(w_ref[...], x_ref[...], preferred_element_type=jnp.float32)
    o_ref[...] = (y + b_ref[...]).astype(o_ref.dtype)


def adjust_layer(x_nchw, conv_weight, bn_gamma, bn_beta,
                 bn_running_mean, bn_running_var, eps=1e-5):
    """Forward pass of AdjustLayer.

    x_nchw:       (N, Cin, H, W) float32
    conv_weight:  (Cout, Cin, 1, 1) float32   (PyTorch 1x1 conv layout)
    bn_*:         (Cout,) float32
    """
    N, Cin, H, W = x_nchw.shape
    Cout = conv_weight.shape[0]

    # Center-crop first (exactly equivalent for a 1x1 conv + per-channel BN).
    if W < 20:
        x_nchw = x_nchw[:, :, 4:11, 4:11]
        _, _, H, W = x_nchw.shape

    P = H * W

    # Fold BatchNorm (inference) into the conv weight and a per-channel bias.
    scale = bn_gamma / jnp.sqrt(bn_running_var + eps)               # (Cout,)
    w = conv_weight.reshape(Cout, Cin) * scale[:, None]             # (Cout, Cin)
    bias = (bn_beta - bn_running_mean * scale).reshape(Cout, 1)     # (Cout, 1)

    # NCHW-native: flatten spatial onto the lane axis.
    x_flat = x_nchw.reshape(N, Cin, P)

    # Tile the spatial axis only when large; pad to a tile multiple so every
    # block is full (padded columns are sliced off afterwards).
    if P <= _TILE_P_MAX:
        tile_p, p_pad = P, P
    else:
        tile_p = _TILE_P_MAX
        p_pad = pl.cdiv(P, tile_p) * tile_p
        if p_pad != P:
            x_flat = jnp.pad(x_flat, ((0, 0), (0, 0), (0, p_pad - P)))

    grid = (N, p_pad // tile_p)

    out_flat = pl.pallas_call(
        _adjust_kernel,
        out_shape=jax.ShapeDtypeStruct((N, Cout, p_pad), x_nchw.dtype),
        grid=grid,
        in_specs=[
            # activation tile: one batch element, one spatial tile per step
            pl.BlockSpec((None, Cin, tile_p), lambda n, p: (n, 0, p)),
            # folded weight: constant block index -> stays VMEM-resident
            pl.BlockSpec((Cout, Cin), lambda n, p: (0, 0)),
            # folded bias: constant block index
            pl.BlockSpec((Cout, 1), lambda n, p: (0, 0)),
        ],
        out_specs=pl.BlockSpec((None, Cout, tile_p), lambda n, p: (n, 0, p)),
        compiler_params=pltpu.CompilerParams(
            dimension_semantics=("parallel", "parallel"),
            vmem_limit_bytes=32 * 1024 * 1024,
        ),
    )(x_flat, w, bias)

    if p_pad != P:
        out_flat = out_flat[:, :, :P]
    return out_flat.reshape(N, Cout, H, W)


def _reference(x_nchw, conv_weight, bn_gamma, bn_beta,
               bn_running_mean, bn_running_var, eps=1e-5):
    """Pure-JAX reference mirroring the PyTorch module (conv -> BN -> crop)."""
    N, Cin, H, W = x_nchw.shape
    Cout = conv_weight.shape[0]
    w = conv_weight.reshape(Cout, Cin)
    y = jnp.einsum('nchw,oc->nohw', x_nchw, w)
    scale = bn_gamma / jnp.sqrt(bn_running_var + eps)
    bias = bn_beta - bn_running_mean * scale
    y = y * scale[None, :, None, None] + bias[None, :, None, None]
    if W < 20:
        y = y[:, :, 4:11, 4:11]
    return y


if __name__ == "__main__":
    key = jax.random.PRNGKey(0)
    k_x, k_w, k_g, k_b, k_m, k_v = jax.random.split(key, 6)

    N, Cin, Cout, H, W = 2, 16, 8, 16, 16   # W=16 < 20 -> crop path exercised

    x = jax.random.normal(k_x, (N, Cin, H, W), dtype=jnp.float32)
    conv_weight = jax.random.normal(k_w, (Cout, Cin, 1, 1), dtype=jnp.float32) * 0.1
    bn_gamma = 1.0 + 0.1 * jax.random.normal(k_g, (Cout,), dtype=jnp.float32)
    bn_beta = 0.1 * jax.random.normal(k_b, (Cout,), dtype=jnp.float32)
    bn_running_mean = 0.1 * jax.random.normal(k_m, (Cout,), dtype=jnp.float32)
    bn_running_var = jnp.abs(1.0 + 0.1 * jax.random.normal(k_v, (Cout,), dtype=jnp.float32))

    out = adjust_layer(x, conv_weight, bn_gamma, bn_beta,
                       bn_running_mean, bn_running_var)
    out = jax.block_until_ready(out)

    ref = _reference(x, conv_weight, bn_gamma, bn_beta,
                     bn_running_mean, bn_running_var)

    assert out.shape == (N, Cout, 7, 7), out.shape
    assert jnp.allclose(out, ref, atol=1e-4, rtol=1e-4), "mismatch vs reference"

    print("KERNEL_OK")
</pallas_src>

<mosaic_0001>
module attributes {stable_mosaic.version = 11 : i64} {
  func.func @_adjust_kernel(%arg0: i32, %arg1: i32, %arg2: memref<1x16x49xf32, #tpu.memory_space<vmem>>, %arg3: memref<8x16xf32, #tpu.memory_space<vmem>>, %arg4: memref<8x1xf32, #tpu.memory_space<vmem>>, %arg5: memref<1x8x49xf32, #tpu.memory_space<vmem>>) attributes {dimension_semantics = [#tpu.dimension_semantics<parallel>, #tpu.dimension_semantics<parallel>], iteration_bounds = array<i64: 2, 1>, scalar_prefetch = 0 : i64, scratch_operands = 0 : i64, tpu.core_type = #tpu.core_type<tc>, window_params = [{transform_indices = @transform_0, window_bounds = array<i64: 1, 16, 49>}, {pipeline_mode = #tpu.pipeline_mode<synchronous>, transform_indices = @transform_1, window_bounds = array<i64: 8, 16>}, {pipeline_mode = #tpu.pipeline_mode<synchronous>, transform_indices = @transform_2, window_bounds = array<i64: 8, 1>}, {transform_indices = @transform_3, window_bounds = array<i64: 1, 8, 49>}]} {
    %c0 = arith.constant 0 : index
    %c0_0 = arith.constant 0 : index
    %0 = vector.load %arg3[%c0, %c0_0] : memref<8x16xf32, #tpu.memory_space<vmem>>, vector<8x16xf32>
    %c0_1 = arith.constant 0 : index
    %c0_2 = arith.constant 0 : index
    %c0_3 = arith.constant 0 : index
    %1 = vector.load %arg2[%c0_1, %c0_2, %c0_3] : memref<1x16x49xf32, #tpu.memory_space<vmem>>, vector<1x16x49xf32>
    %2 = vector.shape_cast %1 : vector<1x16x49xf32> to vector<16x49xf32>
    %cst = arith.constant dense<0.000000e+00> : vector<8x49xf32>
    %3 = tpu.matmul %0, %2, %cst {dimension_numbers = #tpu.dot_dimension_numbers<[1], [0], [0], [1], [0, 0, 1, 1], [], []>} : vector<8x16xf32>, vector<16x49xf32>, vector<8x49xf32> -> vector<8x49xf32>
    %c0_4 = arith.constant 0 : index
    %c0_5 = arith.constant 0 : index
    %4 = vector.load %arg4[%c0_4, %c0_5] : memref<8x1xf32, #tpu.memory_space<vmem>>, vector<8x1xf32>
    %5 = vector.broadcast %4 : vector<8x1xf32> to vector<8x49xf32>
    %6 = arith.addf %3, %5 : vector<8x49xf32>
    %c0_6 = arith.constant 0 : index
    %c0_7 = arith.constant 0 : index
    %c0_8 = arith.constant 0 : index
    %7 = vector.load %arg5[%c0_6, %c0_7, %c0_8] : memref<1x8x49xf32, #tpu.memory_space<vmem>>, vector<1x8x49xf32>
    %8 = vector.shape_cast %7 : vector<1x8x49xf32> to vector<8x49xf32>
    %9 = vector.shape_cast %6 : vector<8x49xf32> to vector<1x8x49xf32>
    tpu.vector_store %arg5[%c0_6, %c0_7, %c0_8], %9 {strides = array<i32>} : memref<1x8x49xf32, #tpu.memory_space<vmem>>, vector<1x8x49xf32>,
    return
  }
  func.func @transform_0(%arg0: i32, %arg1: i32) -> (i32, i32, i32) {
    %c0_i32 = arith.constant 0 : i32
    %c0_i32_0 = arith.constant 0 : i32
    return %arg0, %c0_i32, %arg1 : i32, i32, i32
  }
  func.func @transform_1(%arg0: i32, %arg1: i32) -> (i32, i32) {
    %c0_i32 = arith.constant 0 : i32
    %c0_i32_0 = arith.constant 0 : i32
    %c0_i32_1 = arith.constant 0 : i32
    return %c0_i32, %c0_i32_0 : i32, i32
  }
  func.func @transform_2(%arg0: i32, %arg1: i32) -> (i32, i32) {
    %c0_i32 = arith.constant 0 : i32
    %c0_i32_0 = arith.constant 0 : i32
    %c0_i32_1 = arith.constant 0 : i32
    return %c0_i32, %c0_i32_0 : i32, i32
  }
  func.func @transform_3(%arg0: i32, %arg1: i32) -> (i32, i32, i32) {
    %c0_i32 = arith.constant 0 : i32
    %c0_i32_0 = arith.constant 0 : i32
    return %arg0, %c0_i32, %arg1 : i32, i32, i32
  }
}

</mosaic_0001>

<bundles_post_ra>
// kernel: tpu_custom_call.1
= control target key start
LH: loop header
LB: loop body
LE: loop exit
PB: predicated region body
PF: predicated region fallthrough
CT: control target
= control target key end

     0   :  { %8 = vsyncpa [#allocation3], 0  ;;  %s763_s0 = inlined_call_operand.hbm [shape: f32[2,16,49], index: 0, kind: input, shape index: {}]   ;;  %s764_s1 = inlined_call_operand.vmem [shape: f32[8,16], index: 1, kind: input, shape index: {}]   ;;  %s765_s2 = inlined_call_operand.vmem [shape: f32[8,1], index: 2, kind: input, shape index: {}]   ;;  %s766_s3 = inlined_call_operand.hbm [shape: f32[2,8,49], index: 3, kind: output, shape index: {}]  }
   0x1   :  { %10 = vsyncpa [#allocation3 + $0x1], 0 }
   0x2   :  { %11 = vsyncpa [#allocation4], 0 }
   0x3   :  { %13 = vsyncpa [#allocation4 + $0x1], 0  ;;  %s618_s12 = smov 0   ;;  %s620_s13 = smov 0  }
   0x4   :  { %s622_s14 = smov 0   ;;  %s624_s15 = smov 0  }
   0x5   :  { %s626_s16 = smov 0   ;;  %s628_s17 = smov 0  }
   0x6 LB: > { %s387_s18 = sadd.s32 4294967295, %s589_s17   ;;  %s388_s19 = sadd.s32 4294967294, %s589_s17   ;;  %s589_s17 = sphi %s628_s17, %s19_s17   ;;  %s585_s16 = sphi %s626_s16, %s777_s16   ;;  %s581_s15 = sphi %s624_s15, %s776_s15   ;;  %s577_s14 = sphi %s622_s14, %s775_s14   ;;  %s573_s13 = sphi %s620_s13, %s774_s13   ;;  %s569_s12 = sphi %s618_s12, %s773_s12  }
   0x7   : > { %s31_s20 = sadd.s32 1, %s585_s16  ;;  %s40_s21 = sadd.s32 1, %s577_s14 }
   0x8   : > { %p33_p0 = scmp.ge.s32.totalorder %s31_s20, 2  ;;  %p47_p1 = scmp.ne.s32.totalorder %s577_s14, %s573_s13 }
   0x9   : > { %p48_p2 = scmp.eq.s32.totalorder %s589_s17, 0  ;;  %p53_p3 = scmp.ne.s32.totalorder %s573_s13, %s569_s12 }
   0xa   : > { %s779_s20 = smov (%p33_p0, %s31_s20), 0  ;;  %p54_p5 = scmp.eq.s32.totalorder %s387_s18, 0 }
   0xb   : > { %p659_p4 = por %p48_p2, %p47_p1  ;;  %s35_s23 = ssub.s32 %s585_s16, %s779_s20 }
   0xc   : > { %p121_p6 = scmp.eq.s32.totalorder %s387_s18, 1  ;;  %p38_p7 = scmp.eq.s32.totalorder %s35_s23, 0 }
   0xd   : > { %p665_p8 = por %p54_p5, %p53_p3  ;;  %p127_p10 = scmp.eq.s32.totalorder %s388_s19, 1 }
   0xe   : > { %p669_p9 = por %p121_p6, %p47_p1  ;;  %p425_p13 = scmp.lt.s32.totalorder %s589_s17, 2 }
   0xf   : > { %s674_s26 = scalar_select %p38_p7, %s577_s14, %s40_s21  }
  0x10   : > { %p676_p11 = por %p127_p10, %p53_p3  ;;  %s153_s28 = sand.u32 1, %s577_s14  }
  0x11   : > { %s391_s29 = sshll.u32 %s153_s28, 4  ;;  %s402_s30 = sshll.u32 %s585_s16, 8 }
  0x12   : > { %s164_s6 = scalar_lea.hbm %s763_s0, %s402_s30  ;;  %s157_s7 = scalar_lea.vmem [#allocation2], %s391_s29 }
  0x13   : > { %s165_s8 = sshll.u32 %s157_s7, 4  ;;  %p689_p0 = pnand %p425_p13, %p659_p4  ;;  %s166_s8 = int_to_ptr.vmem [resolvable:$true] %s165_s8 }
  0x14   : > { %p394_p1 = scmp.ge.s32.totalorder %s589_s17, 1  ;;  %s154_s10 = scalar_lea.sflag [#allocation3], %s153_s28 }
  0x15   : > { %p483_p2 = pneg %p689_p0  ;;  %s494_s11 = scalar_lea.vmem %s166_s8, 256 }
  0x16   : > { %p495_p3 = scmp.ne.s32.totalorder %s166_s8, %s494_s11  ;;  %s591_s18 = smov [#allocation2]  }
  0x17   : > { %s499_s19 = sshll.u32 %s591_s18, 4  ;;  %s500_s19 = int_to_ptr.vmem [resolvable:$false] %s499_s19 }
  0x18   : > { %p497_p5 = pnand %p495_p3, %p483_p2  ;;  %s501_s21 = scalar_lea.vmem %s500_s19, 512 }
  0x19   : > { %p502_p7 = scmp.lt.s32.totalorder %s166_s8, %s500_s19  ;;  %p503_p10 = scmp.lt.s32.totalorder %s501_s21, %s494_s11 }
  0x1a   : > { %p498_p6 = pneg %p497_p5 }
  0x1b   : > { %p504_p12 = por %p503_p10, %p502_p7 }
  0x1d   : > { %p505_p4 = pnand %p504_p12, %p498_p6 }
  0x1f   : > { %508 = shalt.err (!%p505_p4)
}
  0x20   : > { %s592_s22 = smov 128   ;;  %s593_s23 = smov 8  }
  0x21   : > { %420 = dma.hbm_to_vmem [thread:$0]  (!%p689_p0), %s164_s6, 256, %s166_s8, %s154_s10, %s592_s22, %s592_s22, %s593_s23  }
  0x22   : > { %p173_p13 = scmp.lt.s32.totalorder %s589_s17, 3 }
  0x24   : > { %p174_p2 = pnand %p394_p1, %p173_p13 }
  0x25   : > { %s702_s28 = sand.u32 (!%p174_p2), 1, %s573_s13  }
  0x26   : > { %177 = sbr.rel (%p174_p2) target bundleno = 257 (0x101), region = 32  ;;  %s395_s29 = sshll.u32 (!%p174_p2), %s702_s28, 4 }
  0x27   : > { %s180_s30 = scalar_lea.sflag (!%p174_p2), [#allocation3], %s702_s28  ;;  %s183_s4 = scalar_lea.vmem (!%p174_p2), [#allocation2], %s395_s29 }
  0x2b   : > { %560 = dma.done.wait (%p665_p8), %s180_s30, 256  }
  0x2c   : > { %562 = vsyncadd (%p665_p8), %s180_s30, 4294967040  ;;  %v594_v0 = vmov 0.0   ;;  %vm595_vm0 = vmmov 0   ;;  %v596_v1 = vmov 0   ;;  %v208_v2 = vld [vmem:[%s183_s4 + $0x8] sm:$0xff]  ;;  %v207_v3 = vld [vmem:[%s183_s4] sm:$0xff] }
  0x2d   : > { %406 = vmatprep.subr.mxu0 %v594_v0  ;;  %410 = vmatprep.mubr.msk.f32.mxu0 %vm595_vm0, %v594_v0  ;;  %v206_v4 = vld [vmem:[%s764_s1] sm:$0xff]  ;;  %vm215_vm1 = vcmask 130048   ;;  %s396_s24 = sshll.u32 %s702_s28, 3  ;;  %s399_s9 = sshll.u32 %s581_s15, 7  ;;  %vm289_vm2 = vcmask 400384  }
  0x2e   : > { %480 = vset.pattern.permute.xlu0 %v596_v1  ;;  %407 = vmatpush3.msra.mxu0 %v208_v2  ;;  %v209_v5 = vld [vmem:[%s765_s2] sm:$0xff]  ;;  %s205_s10 = scalar_lea.vmem [#allocation5], %s396_s24  ;;  %s721_s21 = scalar_lea.hbm %s766_s3, %s399_s9 }
  0x2f   : > { %408 = vmatprep.subr.mxu0 %v594_v0  ;;  %212 = vperm.xlu0 %480, %v209_v5   ;;  %s306_s11 = sshll.u32 %s205_s10, 4  ;;  %s292_s22 = scalar_lea.sflag [#allocation4], %s702_s28  ;;  %s307_s11 = int_to_ptr.vmem [resolvable:$true] %s306_s11 }
  0x30   : > { %409 = vmatpush3.msra.mxu0 %v207_v3  ;;  %s509_s23 = scalar_lea.vmem %s307_s11, 128  ;;  %s597_s15 = smov [#allocation5]  }
  0x31   : > { %411 = vmatmul.mubr.msk.f32.vlgmr.msra.gmra.mxu0 %vm215_vm1, %v206_v4  ;;  %p510_p8 = scmp.ne.s32.totalorder %s307_s11, %s509_s23  ;;  %s513_s29 = sshll.u32 %s597_s15, 4  ;;  %s514_s29 = int_to_ptr.vmem [resolvable:$false] %s513_s29 }
  0x32   : > { %s515_s30 = scalar_lea.vmem %s514_s29, 256  ;;  %p516_p1 = scmp.lt.s32.totalorder %s307_s11, %s514_s29 }
  0x33   : > { %p511_p12 = pnand %p510_p8, %p669_p9  ;;  %p517_p3 = scmp.lt.s32.totalorder %s515_s30, %s509_s23 }
  0x35   : > { %p512_p0 = pneg %p511_p12  ;;  %p518_p5 = por %p517_p3, %p516_p1 }
  0x37   : > { %p519_p6 = pnand %p518_p5, %p512_p0 }
  0xaa   : > { %v213_v6 = vpop.permute.xlu0 %212 }
  0xf1   : > { %v285_v7 = vpop.f32.mrf.mxu0 }
  0xf2   : > { %v286_v8 = vadd.f32 %v285_v7, %v213_v6 }
  0xf3   : > { %v412_v9 = vpop.f32.mrf.mxu0 }
  0xf4   : > { %290 = vst.msk [vmem:[%s205_s10] sm:$0xff] %vm289_vm2, %v286_v8 }
  0xf5   : > { %522 = shalt.err (!%p519_p6)
}
  0xf6   : > { %s523_s4 = scalar_lea.hbm %s721_s21, 128  ;;  %s527_s6 = scalar_lea.hbm %s766_s3, 256 }
  0xf7   : > { %p524_p7 = scmp.ne.s32.totalorder %s721_s21, %s523_s4  ;;  %p528_p13 = scmp.lt.s32.totalorder %s721_s21, %s766_s3 }
  0xf8   : > { %p529_p2 = scmp.lt.s32.totalorder %s527_s6, %s523_s4 }
  0xf9   : > { %p525_p10 = pnand %p524_p7, %p669_p9 }
  0xfa   : > { %p530_p8 = por %p529_p2, %p528_p13 }
  0xfb   : > { %p526_p4 = pneg %p525_p10 }
  0xfd   : > { %p531_p12 = pnand %p530_p8, %p526_p4 }
  0xff   : > { %534 = shalt.err (!%p531_p12)
}
 0x100   : > { %415 = dma.vmem_to_hbm [thread:$0]  (%p669_p9), %s307_s11, 128, %s721_s21, %s292_s22  }
 0x101 PF: > { %s318_s24 = sand.u32 1, %s569_s12   ;;  %p772_p0 = scmp.ge.s32.totalorder %s589_s17, 2 }
 0x102   : > { %s319_s9 = scalar_lea.sflag [#allocation4], %s318_s24 }
 0x103   : > { %p422_p1 = pnand %p772_p0, %p676_p11 }
 0x105   : > { %p423_p3 = pneg %p422_p1 }
 0x107   : > { %564 = dma.done.wait (%p423_p3), %s319_s9, 128  }
 0x108   : > { %566 = vsyncadd (%p423_p3), %s319_s9, 4294967168  ;;  %s19_s17 = sadd.s32 1, %s589_s17   ;;  %s773_s12 = smov %s573_s13 }
 0x109   : > { %p16_p5 = scmp.ge.s32.totalorder %s19_s17, 4   ;;  %s774_s13 = smov %s577_s14 }
 0x10a   : > { %s775_s14 = smov %s674_s26  ;;  %s776_s15 = smov %s585_s16 }
 0x10b   : > { %s777_s16 = smov %s779_s20  ;;  %18 = sbr.rel (!%p16_p5) target bundleno = 6 (0x6), region = 77 }
 0x110   :  { %324 = vsyncpa [#allocation3], 1 }
 0x111   :  { %326 = vsyncpa [#allocation3 + $0x1], 1 }
 0x112   :  { %327 = vsyncpa [#allocation4], 1 }
 0x113   :  { %329 = vsyncpa [#allocation4 + $0x1], 1 }

</bundles_post_ra>
